<compile_context>
chip_gen: v5e
topology: v5e:2x2
jax: 0.10.0
libtpu: 0.0.40
codegen_flags: <defaults>
</compile_context>

<pallas_src>
import jax
import jax.numpy as jnp
from jax import lax
from jax.experimental import pallas as pl
from jax.experimental.pallas import tpu as pltpu


def _round_up(x, m):
    return -(-x // m) * m


# ---------------------------------------------------------------------------
# Kernel 1: hoisted input projection   x_proj = x @ W_ih^T + (b_ih + b_hh)
# One big (rows, D) x (D, 4H) bf16 matmul (f32 accumulate) instead of T tiny
# ones inside the recurrence.  Output stored bf16.
# ---------------------------------------------------------------------------
def _input_proj_kernel(x_ref, w_ref, b_ref, o_ref):
    acc = jnp.dot(x_ref[...], w_ref[...], preferred_element_type=jnp.float32)
    o_ref[...] = (acc + b_ref[...]).astype(o_ref.dtype)


# ---------------------------------------------------------------------------
# Kernel 2: masked LSTM recurrence, t_blk timesteps per grid step.
# Grid = (batch_block [parallel], time_block [arbitrary]).
# Gate layout (reordered in the wrapper): [i | f | o | g].
# ---------------------------------------------------------------------------
def _lstm_recurrent_kernel(maxlen_ref, len_ref, xp_ref, whh_ref, out_ref,
                           h_sc, c_sc):
    tb = pl.program_id(1)
    n_tb = pl.num_programs(1)
    t_blk = xp_ref.shape[0]
    H = whh_ref.shape[0]

    # init_lstm = zeros; re-init at the first time block of every batch block.
    @pl.when(tb == 0)
    def _():
        h_sc[...] = jnp.zeros_like(h_sc)
        c_sc[...] = jnp.zeros_like(c_sc)

    t0 = tb * t_blk

    # Skip whole time blocks past the longest sequence (the per-row mask below
    # already guarantees correctness; this plus the clamped index_map makes
    # dead blocks free).
    @pl.when(t0 < maxlen_ref[0])
    def _():
        whh = whh_ref[...]                                   # (H, 4H) bf16
        # Hoisted: broadcast lens once, not per unrolled iteration.
        lens_b = jnp.broadcast_to(len_ref[...], (len_ref.shape[0], H))

        def step(s, carry):
            h, c = carry
            # x-projection precomputed; only the recurrent matmul is on the
            # serial critical path.  bf16 operands, f32 accumulate.
            gates = xp_ref[s].astype(jnp.float32) + jnp.dot(
                h.astype(jnp.bfloat16), whh,
                preferred_element_type=jnp.float32)
            # Reordered gates: one sigmoid over [i|f|o], one tanh over [g].
            # (Keep H a multiple of 128 in production so slices are
            # lane-aligned; H=32 toy is correct but relayouts.)
            sig = jax.nn.sigmoid(gates[:, :3 * H])
            i_g = sig[:, 0 * H:1 * H]
            f_g = sig[:, 1 * H:2 * H]
            o_g = sig[:, 2 * H:3 * H]
            g_g = jnp.tanh(gates[:, 3 * H:])
            c_new = f_g * c + i_g * g_g
            h_new = o_g * jnp.tanh(c_new)
            # packed-sequence semantics: freeze rows once t >= sent_len[b]
            mask = (t0 + s) < lens_b
            return jnp.where(mask, h_new, h), jnp.where(mask, c_new, c)

        h, c = lax.fori_loop(0, t_blk, step, (h_sc[...], c_sc[...]),
                             unroll=min(t_blk, 8))
        h_sc[...] = h
        c_sc[...] = c

    @pl.when(tb == n_tb - 1)
    def _():
        out_ref[...] = h_sc[...].astype(out_ref.dtype)


def lstm_encoder(sent, sent_len, w_ih, w_hh, b_ih, b_hh, *,
                 t_blk=16, b_blk=None):
    """sent: (T, B, D) f32; sent_len: (B,) int; returns (B, H) final hidden.

    b_blk=None -> one batch block (whole padded batch, capped at 128).  On
    v7x pass b_blk = B_pad // 2 for one block per TensorCore.
    """
    T, B, D = sent.shape
    H = w_hh.shape[1]
    G = 4 * H

    # Pad time to a multiple of t_blk; pad batch to the sublane tile (8) and
    # pick one big batch block (padded rows have length 0 -> frozen at zero).
    T_pad = _round_up(T, t_blk)
    B_pad8 = _round_up(B, 8)
    if b_blk is None:
        b_blk = B_pad8 if B_pad8 <= 128 else 128
    B_pad = _round_up(B_pad8, b_blk)

    sent_p = jnp.pad(sent, ((0, T_pad - T), (0, B_pad - B), (0, 0)))
    lens_p = jnp.pad(sent_len.astype(jnp.int32), ((0, B_pad - B),))

    # Reorder PyTorch gate rows [i,f,g,o] -> [i,f,o,g] once, pre-transpose
    # weights, pre-sum bias.  Recurrent / input-proj weights in bf16.
    perm = jnp.concatenate([jnp.arange(0, H), jnp.arange(H, 2 * H),
                            jnp.arange(3 * H, 4 * H), jnp.arange(2 * H, 3 * H)])
    wih_t = w_ih[perm].T.astype(jnp.bfloat16)        # (D, 4H) bf16
    whh_t = w_hh[perm].T.astype(jnp.bfloat16)        # (H, 4H) bf16
    bias = (b_ih + b_hh)[perm].reshape(1, G).astype(jnp.float32)

    # ---- hoisted input projection: one tiled matmul over all T*B rows ----
    rows = T_pad * B_pad
    row_blk = t_blk * B_pad                          # multiple of 8, divides rows
    x2d = sent_p.astype(jnp.bfloat16).reshape(rows, D)

    x_proj = pl.pallas_call(
        _input_proj_kernel,
        out_shape=jax.ShapeDtypeStruct((rows, G), jnp.bfloat16),
        grid_spec=pltpu.PrefetchScalarGridSpec(
            num_scalar_prefetch=0,
            grid=(rows // row_blk,),
            in_specs=[
                pl.BlockSpec((row_blk, D), lambda r: (r, 0)),
                pl.BlockSpec((D, G), lambda r: (0, 0)),
                pl.BlockSpec((1, G), lambda r: (0, 0)),
            ],
            out_specs=pl.BlockSpec((row_blk, G), lambda r: (r, 0)),
        ),
        compiler_params=pltpu.CompilerParams(
            dimension_semantics=("parallel",)),
    )(x2d, wih_t, bias).reshape(T_pad, B_pad, G)

    # ---- recurrent kernel ----
    max_len = jnp.max(lens_p).astype(jnp.int32).reshape(1)     # scalar prefetch
    lens2d = lens_p.reshape(B_pad, 1)

    # Clamp the x_proj time-block index to the last live block so dead blocks
    # (t0 >= max_len) repeat the previous block index and Pallas elides the
    # DMA; the pl.when guard in the kernel skips their compute.
    def _xp_map(bb, tb, ml):
        last_live = jnp.maximum(ml[0] - 1, 0) // t_blk
        return (jnp.minimum(tb, last_live), bb, 0)

    out = pl.pallas_call(
        _lstm_recurrent_kernel,
        out_shape=jax.ShapeDtypeStruct((B_pad, H), sent.dtype),
        grid_spec=pltpu.PrefetchScalarGridSpec(
            num_scalar_prefetch=1,                   # max_len -> SMEM
            grid=(B_pad // b_blk, T_pad // t_blk),
            in_specs=[
                pl.BlockSpec((b_blk, 1), lambda bb, tb, ml: (bb, 0)),   # lens
                pl.BlockSpec((t_blk, b_blk, G), _xp_map),               # x_proj
                pl.BlockSpec((H, G), lambda bb, tb, ml: (0, 0)),        # W_hh^T
            ],
            out_specs=pl.BlockSpec((b_blk, H), lambda bb, tb, ml: (bb, 0)),
            scratch_shapes=[
                pltpu.VMEM((b_blk, H), jnp.float32),   # h state
                pltpu.VMEM((b_blk, H), jnp.float32),   # c state
            ],
        ),
        compiler_params=pltpu.CompilerParams(
            # batch blocks independent (v7x megacore); time is serial.
            dimension_semantics=("parallel", "arbitrary"),
            vmem_limit_bytes=64 * 1024 * 1024),
    )(max_len, lens2d, x_proj, whh_t)

    return out[:B]


def lstm_ref(sent, sent_len, w_ih, w_hh, b_ih, b_hh):
    """Pure-JAX f32 reference of the masked (packed-equivalent) LSTM."""
    T, B, D = sent.shape
    H = w_hh.shape[1]

    def step(carry, inp):
        h, c = carry
        x, t = inp
        gates = x @ w_ih.T + h @ w_hh.T + b_ih + b_hh
        i, f, g, o = jnp.split(gates, 4, axis=-1)
        i = jax.nn.sigmoid(i)
        f = jax.nn.sigmoid(f)
        g = jnp.tanh(g)
        o = jax.nn.sigmoid(o)
        c_new = f * c + i * g
        h_new = o * jnp.tanh(c_new)
        m = (t < sent_len)[:, None]
        return (jnp.where(m, h_new, h), jnp.where(m, c_new, c)), None

    init = (jnp.zeros((B, H), jnp.float32), jnp.zeros((B, H), jnp.float32))
    (h, _), _ = jax.lax.scan(step, init, (sent, jnp.arange(T)))
    return h


if __name__ == "__main__":
    # T chosen so the grid has live and dead time blocks (t_blk=16, max len 20).
    T, B, D, H = 40, 4, 16, 32   # seq_len, batch, word_emb_dim, enc_lstm_dim
    key = jax.random.PRNGKey(0)
    k = jax.random.split(key, 5)

    sent = jax.random.normal(k[0], (T, B, D), dtype=jnp.float32)
    sent_len = jnp.array([20, 13, 5, 18], dtype=jnp.int32)   # variable lengths <= T

    # PyTorch nn.LSTM init: U(-1/sqrt(H), 1/sqrt(H))
    scale = 1.0 / (H ** 0.5)
    w_ih = jax.random.uniform(k[1], (4 * H, D), jnp.float32, -scale, scale)
    w_hh = jax.random.uniform(k[2], (4 * H, H), jnp.float32, -scale, scale)
    b_ih = jax.random.uniform(k[3], (4 * H,), jnp.float32, -scale, scale)
    b_hh = jax.random.uniform(k[4], (4 * H,), jnp.float32, -scale, scale)

    emb = lstm_encoder(sent, sent_len, w_ih, w_hh, b_ih, b_hh)
    jax.block_until_ready(emb)

    ref = lstm_ref(sent, sent_len, w_ih, w_hh, b_ih, b_hh)
    assert emb.shape == (B, H)
    # bf16 matmul operands / bf16 x_proj storage with f32 accumulation:
    # relaxed tolerance vs. the pure-f32 reference.
    assert jnp.allclose(emb, ref, atol=3e-2, rtol=3e-2)
    print("KERNEL_OK")
</pallas_src>

<mosaic_0001>
module attributes {stable_mosaic.version = 11 : i64} {
  func.func @_input_proj_kernel(%arg0: i32, %arg1: memref<128x16xbf16, #tpu.memory_space<vmem>>, %arg2: memref<16x128xbf16, #tpu.memory_space<vmem>>, %arg3: memref<1x128xf32, #tpu.memory_space<vmem>>, %arg4: memref<128x128xbf16, #tpu.memory_space<vmem>>) attributes {dimension_semantics = [#tpu.dimension_semantics<parallel>], iteration_bounds = array<i64: 3>, scalar_prefetch = 0 : i64, scratch_operands = 0 : i64, tpu.core_type = #tpu.core_type<tc>, window_params = [{transform_indices = @transform_0, window_bounds = array<i64: 128, 16>}, {pipeline_mode = #tpu.pipeline_mode<synchronous>, transform_indices = @transform_1, window_bounds = array<i64: 16, 128>}, {pipeline_mode = #tpu.pipeline_mode<synchronous>, transform_indices = @transform_2, window_bounds = array<i64: 1, 128>}, {transform_indices = @transform_3, window_bounds = array<i64: 128, 128>}]} {
    %c0 = arith.constant 0 : index
    %c0_0 = arith.constant 0 : index
    %0 = vector.load %arg1[%c0, %c0_0] : memref<128x16xbf16, #tpu.memory_space<vmem>>, vector<128x16xbf16>
    %c0_1 = arith.constant 0 : index
    %c0_2 = arith.constant 0 : index
    %1 = vector.load %arg2[%c0_1, %c0_2] : memref<16x128xbf16, #tpu.memory_space<vmem>>, vector<16x128xbf16>
    %cst = arith.constant dense<0.000000e+00> : vector<128x128xf32>
    %2 = tpu.matmul %0, %1, %cst {dimension_numbers = #tpu.dot_dimension_numbers<[1], [0], [0], [1], [0, 0, 1, 1], [], []>} : vector<128x16xbf16>, vector<16x128xbf16>, vector<128x128xf32> -> vector<128x128xf32>
    %c0_3 = arith.constant 0 : index
    %c0_4 = arith.constant 0 : index
    %3 = vector.load %arg3[%c0_3, %c0_4] : memref<1x128xf32, #tpu.memory_space<vmem>>, vector<1x128xf32>
    %4 = vector.broadcast %3 : vector<1x128xf32> to vector<128x128xf32>
    %5 = arith.addf %2, %4 : vector<128x128xf32>
    %6 = arith.truncf %5 : vector<128x128xf32> to vector<128x128xbf16>
    %c0_5 = arith.constant 0 : index
    %c0_6 = arith.constant 0 : index
    %7 = vector.load %arg4[%c0_5, %c0_6] : memref<128x128xbf16, #tpu.memory_space<vmem>>, vector<128x128xbf16>
    tpu.vector_store %arg4[%c0_5, %c0_6], %6 {strides = array<i32>} : memref<128x128xbf16, #tpu.memory_space<vmem>>, vector<128x128xbf16>,
    return
  }
  func.func @transform_0(%arg0: i32) -> (i32, i32) {
    %c0_i32 = arith.constant 0 : i32
    %c0_i32_0 = arith.constant 0 : i32
    return %arg0, %c0_i32 : i32, i32
  }
  func.func @transform_1(%arg0: i32) -> (i32, i32) {
    %c0_i32 = arith.constant 0 : i32
    %c0_i32_0 = arith.constant 0 : i32
    %c0_i32_1 = arith.constant 0 : i32
    return %c0_i32, %c0_i32_0 : i32, i32
  }
  func.func @transform_2(%arg0: i32) -> (i32, i32) {
    %c0_i32 = arith.constant 0 : i32
    %c0_i32_0 = arith.constant 0 : i32
    %c0_i32_1 = arith.constant 0 : i32
    return %c0_i32, %c0_i32_0 : i32, i32
  }
  func.func @transform_3(%arg0: i32) -> (i32, i32) {
    %c0_i32 = arith.constant 0 : i32
    %c0_i32_0 = arith.constant 0 : i32
    return %arg0, %c0_i32 : i32, i32
  }
}

</mosaic_0001>

<bundles_post_ra>
// kernel: tpu_custom_call.1
= control target key start
LH: loop header
LB: loop body
LE: loop exit
PB: predicated region body
PF: predicated region fallthrough
CT: control target
= control target key end

     0   :  { %8 = vsyncpa [#allocation3], 0  ;;  %s782_s0 = inlined_call_operand.vmem [shape: bf16[384,16], index: 0, kind: input, shape index: {}]   ;;  %s783_s1 = inlined_call_operand.vmem [shape: bf16[16,128], index: 1, kind: input, shape index: {}]   ;;  %s784_s2 = inlined_call_operand.vmem [shape: f32[1,128], index: 2, kind: input, shape index: {}]   ;;  %s785_s3 = inlined_call_operand.hbm [shape: bf16[384,128], index: 3, kind: output, shape index: {}]  }
   0x1   :  { %10 = vsyncpa [#allocation3 + $0x1], 0  ;;  %s669_s12 = smov 0   ;;  %s671_s13 = smov 0  }
   0x2   :  { %s673_s14 = smov 0   ;;  %s675_s15 = smov 0  }
   0x3 LB: > { %s690_s16 = sadd.s32 4294967295, %s645_s15   ;;  %s425_s17 = sadd.s32 4294967294, %s645_s15   ;;  %s645_s15 = sphi %s675_s15, %s791_s15   ;;  %s641_s14 = sphi %s673_s14, %s790_s14   ;;  %s637_s13 = sphi %s671_s13, %s789_s13   ;;  %s633_s12 = sphi %s669_s12, %s788_s12  }
   0x4   : > { %s694_s18 = sadd.s32 1, %s645_s15   ;;  %s91_s19 = sadd.s32 1, %s641_s14 }
   0x5   : > { %s88_s20 = ssub.s32 %s645_s15, %s694_s18  ;;  %p101_p0 = scmp.ne.s32.totalorder %s641_s14, %s637_s13 }
   0x6   : > { %p89_p1 = scmp.eq.s32.totalorder %s88_s20, 0  ;;  %p102_p2 = scmp.eq.s32.totalorder %s690_s16, 2 }
   0x7   : > { %p107_p3 = scmp.ne.s32.totalorder %s637_s13, %s633_s12  ;;  %p108_p4 = scmp.eq.s32.totalorder %s425_s17, 2 }
   0x8   : > { %s705_s21 = scalar_select %p89_p1, %s641_s14, %s91_s19  }
   0x9   : > { %p707_p5 = por %p102_p2, %p101_p0  ;;  %p711_p6 = por %p108_p4, %p107_p3 }
   0xa   : > { %p428_p7 = scmp.ge.s32.totalorder %s645_s15, 1  ;;  %p141_p8 = scmp.lt.s32.totalorder %s645_s15, 4 }
   0xc   : > { %p142_p9 = pnand %p428_p7, %p141_p8 }
   0xd   : > { %s430_s26 = sshll.u32 (!%p142_p9), %s690_s16, 4  ;;  %s162_s4 = sand.u32 (!%p142_p9), 1, %s637_s13  }
   0xe   : > { %145 = sbr.rel (%p142_p9) target bundleno = 189 (0xbd), region = 32  ;;  %p166_p10 = scmp.lt.s32.totalorder (!%p142_p9), %s430_s26, 47 }
   0xf   : > { %s429_s7 = sshll.u32 (!%p142_p9), %s162_s4, 6  ;;  %s490_s9 = sshll.u32 (!%p142_p9), %s690_s16, 6 }
  0x10   : > { %s738_s8 = scalar_lea.vmem (!%p142_p9), [#allocation2], %s429_s7  ;;  %s359_s17 = scalar_lea.hbm (!%p142_p9), %s785_s3, %s490_s9 }
  0x11   : > { %s360_s19 = sshll.u32 (!%p142_p9), %s738_s8, 4  ;;  %s362_s20 = sshll.u32 (!%p142_p9), %s359_s17, 4  ;;  %s361_s19 = int_to_ptr.vmem [resolvable:$true] %s360_s19  ;;  %s363_s20 = int_to_ptr.hbm [resolvable:$true] %s362_s20 }
  0x12   : > { %s348_s16 = scalar_lea.sflag (!%p142_p9), [#allocation3], %s162_s4  ;;  %s597_s24 = sshra.s32 (!%p142_p9), %s363_s20, 4  ;;  %s598_s24 = int_to_ptr.hbm [resolvable:$true] %s597_s24 }
  0x13   : > { %v489_v0 = vld [vmem:[%s783_s1] sm:$0xff]  ;;  %s793_s26 = smov (!%p166_p10, %s430_s26), 47  ;;  %vm241_vm0 = vcmask 130048   ;;  %s599_s25 = scalar_lea.hbm %s598_s24, 64 }
  0x14   : > { %273 = vmatpush.bf16.msra.mxu0 %v489_v0  ;;  %538 = vmatpush.bf16.msra.mxu1 %v489_v0  ;;  %s431_s27 = sshll.u32 %s793_s26, 2  ;;  %v582_v11 = vld [vmem:[%s784_s2] ss:$0 sm:$0xff]  ;;  %p600_p11 = scmp.ne.s32.totalorder %s598_s24, %s599_s25 }
  0x15   : > { %539 = vmatpush.bf16.msra.mxu2 %v489_v0  ;;  %540 = vmatpush.bf16.msra.mxu3 %v489_v0  ;;  %s169_s30 = scalar_lea.vmem %s782_s0, %s431_s27  ;;  %s603_s28 = scalar_lea.hbm %s785_s3, 192 }
  0x16   : > { %v481_v1 = vld [vmem:[%s169_s30] sm:$0xff]  ;;  %v483_v2 = vld [vmem:[%s169_s30 + $0x10] sm:$0xff]  ;;  %v482_v5 = vld [vmem:[%s169_s30 + $0x8] sm:$0xff]  ;;  %p601_p12 = pnand %p600_p11, %p707_p5  ;;  %p604_p0 = scmp.lt.s32.totalorder %s598_s24, %s785_s3 }
  0x17   : > { %v485_v3 = vld [vmem:[%s169_s30 + $0x20] sm:$0xff]  ;;  %v487_v4 = vld [vmem:[%s169_s30 + $0x30] sm:$0xff]  ;;  %468 = vmatmul.msk.bf16.vlgmr.msra.gmra.mxu0 %vm241_vm0, %v481_v1  ;;  %470 = vmatmul.msk.bf16.vlgmr.msra.gmra.mxu1 %vm241_vm0, %v483_v2  ;;  %v484_v6 = vld [vmem:[%s169_s30 + $0x18] sm:$0xff]  ;;  %p605_p1 = scmp.lt.s32.totalorder %s603_s28, %s599_s25 }
  0x18   : > { %472 = vmatmul.msk.bf16.vlgmr.msra.gmra.mxu2 %vm241_vm0, %v485_v3  ;;  %474 = vmatmul.msk.bf16.vlgmr.msra.gmra.mxu3 %vm241_vm0, %v487_v4  ;;  %v486_v7 = vld [vmem:[%s169_s30 + $0x28] sm:$0xff]  ;;  %v488_v8 = vld [vmem:[%s169_s30 + $0x38] sm:$0xff]  ;;  %p602_p13 = pneg %p601_p12 }
  0x19   : > { %p606_p2 = por %p605_p1, %p604_p0 }
  0x1b   : > { %p607_p3 = pnand %p606_p2, %p602_p13 }
  0x27   : > { %469 = vmatmul.msk.bf16.gmra.mxu0 %vm241_vm0, %v482_v5  ;;  %471 = vmatmul.msk.bf16.gmra.mxu1 %vm241_vm0, %v484_v6 }
  0x28   : > { %473 = vmatmul.msk.bf16.gmra.mxu2 %vm241_vm0, %v486_v7  ;;  %475 = vmatmul.msk.bf16.gmra.mxu3 %vm241_vm0, %v488_v8 }
  0x94   : > { %v275_v9 = vpop.f32.mrf.mxu0  ;;  %v285_v10 = vpop.f32.mrf.mxu1 }
  0x95   : > { %v276_v16 = vadd.f32 %v582_v11, %v275_v9  ;;  %v286_v17 = vadd.f32 %v582_v11, %v285_v10 }
  0x9b   : > { %v295_v12 = vpop.f32.mrf.mxu2  ;;  %v305_v13 = vpop.f32.mrf.mxu3 }
  0x9c   : > { %v277_v14 = vpop.f32.mrf.mxu0  ;;  %v287_v15 = vpop.f32.mrf.mxu1  ;;  %v296_v24 = vadd.f32 %v582_v11, %v295_v12  ;;  %v306_v25 = vadd.f32 %v582_v11, %v305_v13 }
  0x9d   : > { %v278_v18 = vadd.f32 %v582_v11, %v277_v14  ;;  %v288_v19 = vadd.f32 %v582_v11, %v287_v15 }
  0x9f   : > { %v494_v20 = vpack.c.bf16 %v278_v18, %v276_v16  ;;  %v504_v21 = vpack.c.bf16 %v288_v19, %v286_v17 }
  0xa1   : > { %495 = vst [vmem:[%s738_s8] sm:$0xff] %v494_v20  }
  0xa2   : > { %532 = vst [vmem:[%s738_s8 + $0x10] sm:$0xff] %v504_v21  }
  0xa3   : > { %v297_v22 = vpop.f32.mrf.mxu2  ;;  %v307_v23 = vpop.f32.mrf.mxu3 }
  0xa4   : > { %v298_v26 = vadd.f32 %v582_v11, %v297_v22  ;;  %v308_v27 = vadd.f32 %v582_v11, %v307_v23  ;;  %v280_v28 = vpop.f32.mrf.mxu0  ;;  %v290_v29 = vpop.f32.mrf.mxu1 }
  0xa5   : > { %v281_v36 = vadd.f32 %v582_v11, %v280_v28  ;;  %v291_v37 = vadd.f32 %v582_v11, %v290_v29 }
  0xa6   : > { %v514_v30 = vpack.c.bf16 %v298_v26, %v296_v24  ;;  %v524_v31 = vpack.c.bf16 %v308_v27, %v306_v25 }
  0xa8   : > { %534 = vst [vmem:[%s738_s8 + $0x20] sm:$0xff] %v514_v30  }
  0xa9   : > { %536 = vst [vmem:[%s738_s8 + $0x30] sm:$0xff] %v524_v31  }
  0xab   : > { %v300_v32 = vpop.f32.mrf.mxu2  ;;  %v310_v33 = vpop.f32.mrf.mxu3 }
  0xac   : > { %v282_v34 = vpop.f32.mrf.mxu0  ;;  %v292_v35 = vpop.f32.mrf.mxu1  ;;  %v301_v44 = vadd.f32 %v582_v11, %v300_v32  ;;  %v311_v45 = vadd.f32 %v582_v11, %v310_v33 }
  0xad   : > { %v283_v38 = vadd.f32 %v582_v11, %v282_v34  ;;  %v293_v39 = vadd.f32 %v582_v11, %v292_v35 }
  0xaf   : > { %v499_v40 = vpack.c.bf16 %v283_v38, %v281_v36  ;;  %v509_v41 = vpack.c.bf16 %v293_v39, %v291_v37 }
  0xb1   : > { %531 = vst [vmem:[%s738_s8 + $0x8] sm:$0xff] %v499_v40  }
  0xb2   : > { %533 = vst [vmem:[%s738_s8 + $0x18] sm:$0xff] %v509_v41  }
  0xb3   : > { %v302_v42 = vpop.f32.mrf.mxu2  ;;  %v312_v43 = vpop.f32.mrf.mxu3 }
  0xb4   : > { %v303_v46 = vadd.f32 %v582_v11, %v302_v42  ;;  %v313_v47 = vadd.f32 %v582_v11, %v312_v43 }
  0xb6   : > { %v519_v48 = vpack.c.bf16 %v303_v46, %v301_v44  ;;  %v529_v49 = vpack.c.bf16 %v313_v47, %v311_v45 }
  0xb8   : > { %535 = vst [vmem:[%s738_s8 + $0x28] sm:$0xff] %v519_v48  }
  0xb9   : > { %537 = vst [vmem:[%s738_s8 + $0x38] sm:$0xff] %v529_v49  }
  0xba   : > { %610 = shalt.err (!%p607_p3)
}
  0xbb   : > { %s647_s4 = smov 64   ;;  %s648_s5 = smov 4  }
  0xbc   : > { %541 = dma.vmem_to_hbm [thread:$0]  (%p707_p5), %s361_s19, 1024, %s363_s20, %s348_s16, %s647_s4, %s647_s4, %s648_s5  }
  0xbd PF: > { %p547_p4 = scmp.ge.s32.totalorder %s645_s15, 2  ;;  %s377_s6 = sand.u32 1, %s633_s12  }
  0xbe   : > { %s378_s7 = scalar_lea.sflag [#allocation3], %s377_s6 }
  0xbf   : > { %p544_p7 = pnand %p547_p4, %p711_p6 }
  0xc1   : > { %p545_p8 = pneg %p544_p7 }
  0xc3   : > { %628 = dma.done.wait (%p545_p8), %s378_s7, 1024  }
  0xc4   : > { %630 = vsyncadd (%p545_p8), %s378_s7, 4294966272  ;;  %p13_p9 = scmp.ge.s32.totalorder %s694_s18, 5   ;;  %s788_s12 = smov %s637_s13 }
  0xc5   : > { %s789_s13 = smov %s641_s14  ;;  %s790_s14 = smov %s705_s21 }
  0xc6   : > { %s791_s15 = smov %s694_s18  ;;  %15 = sbr.rel (!%p13_p9) target bundleno = 3 (0x3), region = 67 }
  0xcb   :  { %384 = vsyncpa [#allocation3], 1 }
  0xcc   :  { %386 = vsyncpa [#allocation3 + $0x1], 1 }

</bundles_post_ra>
